<compile_context>
chip_gen: v6e
topology: v6e:2x2x1
jax: 0.10.0
libtpu: 0.0.40
codegen_flags: <defaults>
</compile_context>

<pallas_src>
import math

import numpy as np
import jax
import jax.numpy as jnp
from jax import lax
from jax.experimental import pallas as pl
from jax.experimental.pallas import tpu as pltpu

# ---- problem sizes (small, consistent with the module's __init__) ----
BS = 2            # batch size
N_AGENTS = 3
N_OTHERS = 5
N_TOKENS = N_AGENTS + N_OTHERS       # 8
BT = BS * N_TOKENS                   # 16 (batch folded into tokens)
DO = 10           # observation_dim
DC = 6            # attribute_dim
DE = 12           # entity_dim
DH = 32           # coach_hidden_dim
N_HEADS = 4
HEAD_DIM = DH // N_HEADS             # 8

ENC_IN = DO + DC + DE                # 28
ENC_PAD = 32                         # padded encoder-input width (== DH)
COL_AG = ENC_IN                      # indicator column -> adds agent-encoder bias
COL_OT = ENC_IN + 1                  # indicator column -> adds other-encoder bias

# activation-slab lane layout: [ xin | eps | additive mask ] -> (16, 128)
A_XIN = 0
A_EPS = ENC_PAD                      # 32
A_MSK = ENC_PAD + DH                 # 64
A_COLS = A_MSK + N_HEADS * BT        # 128

# weight-slab layout: 128-lane-aligned segments, bias row at sublane 32 -> (40, 512)
SEG = 128
W_ENC0 = 0 * SEG                     # encoder weight      lanes [0, 32)
W_QKV0 = 1 * SEG                     # fused QKV weight    lanes [128, 224)
W_O0   = 2 * SEG                     # output projection   lanes [256, 288)
W_ML0  = 3 * SEG                     # mean|logvar weight  lanes [384, 448)
W_COLS = 4 * SEG                     # 512
BIAS_ROW = DH                        # 32
W_ROWS = 40                          # 32 weight rows + 1 bias row + 7 zero rows

BT_SHIFT = BT.bit_length() - 1       # 4  (BT == 16, power of two)
HD_SHIFT = HEAD_DIM.bit_length() - 1 # 3  (HEAD_DIM == 8, power of two)
assert (1 << BT_SHIFT) == BT and (1 << HD_SHIFT) == HEAD_DIM and A_COLS == 128

# batch-block (same-batch) mask over the folded token axis -- static constant
_BID = np.repeat(np.arange(BS), N_TOKENS)
SAME_BATCH = (_BID[:, None] == _BID[None, :])          # (16, 16) numpy bool


def coach_kernel(act_ref, w_ref, out_ref):
    f32 = jnp.float32

    xin   = act_ref[:, A_XIN:A_XIN + ENC_PAD]          # (16, 32) padded encoder input
    eps   = act_ref[:, A_EPS:A_EPS + DH]               # (16, 32) reparameterization noise
    amask = act_ref[:, A_MSK:A_MSK + N_HEADS * BT]     # (16, 64) additive 0/-1e9 key mask

    # --- fused agent/other encoder (per-token-type biases folded via indicator cols) ---
    x = jnp.dot(xin, w_ref[0:ENC_PAD, W_ENC0:W_ENC0 + DH],
                preferred_element_type=f32)                          # (16, 32)

    # --- fused Q/K/V projection (q weight/bias pre-scaled by 1/sqrt(head_dim)) ---
    qkv = (jnp.dot(x, w_ref[0:DH, W_QKV0:W_QKV0 + 3 * DH],
                   preferred_element_type=f32)
           + w_ref[BIAS_ROW:BIAS_ROW + 1, W_QKV0:W_QKV0 + 3 * DH])   # (16, 96)
    q = qkv[:, 0:DH]
    k = qkv[:, DH:2 * DH]
    v = qkv[:, 2 * DH:3 * DH]

    # --- block-diagonal-head attention: all 4 heads in one lane-dense 2-D matmul ---
    # head-block selector: vmask[r, c] = 1 iff (r // 16) == (c // 8)   (static, VPU iota)
    r64 = lax.broadcasted_iota(jnp.int32, (N_HEADS * BT, DH), 0)
    c32 = lax.broadcasted_iota(jnp.int32, (N_HEADS * BT, DH), 1)
    vmask = (jnp.right_shift(r64, BT_SHIFT)
             == jnp.right_shift(c32, HD_SHIFT)).astype(f32)          # (64, 32)

    kbd = jnp.concatenate([k, k, k, k], axis=0) * vmask              # (64, 32) block-diag K
    vbd = jnp.concatenate([v, v, v, v], axis=0) * vmask              # (64, 32) block-diag V

    # scores: sc[n, h*16+m] = <q_h[n], k_h[m]>  (feature-axis contraction, no transpose)
    sc = lax.dot_general(q, kbd, (((1,), (1,)), ((), ())),
                         preferred_element_type=f32) + amask         # (16, 64)
    # row max over all 64 lanes >= each head's max -> numerically valid & stable
    sc = sc - jnp.max(sc, axis=-1, keepdims=True)
    p = jnp.exp(sc)                                                  # masked lanes -> 0

    num = jnp.dot(p, vbd, preferred_element_type=f32)                # (16, 32) head-concat
    den = jnp.dot(p, vmask, preferred_element_type=f32)              # (16, 32) per-head sums
    # approx=True (EUP) is a further option; kept exact to hold the 1e-4 tolerance.
    att = num * pl.reciprocal(den, approx=False)

    # --- single fused output projection ---
    h = (jnp.dot(att, w_ref[0:DH, W_O0:W_O0 + DH], preferred_element_type=f32)
         + w_ref[BIAS_ROW:BIAS_ROW + 1, W_O0:W_O0 + DH])             # (16, 32)

    # --- fused strategy head (mean | logvar) + reparameterization ---
    ml = (jnp.dot(h, w_ref[0:DH, W_ML0:W_ML0 + 2 * DH], preferred_element_type=f32)
          + w_ref[BIAS_ROW:BIAS_ROW + 1, W_ML0:W_ML0 + 2 * DH])      # (16, 64)
    mu = ml[:, 0:DH]
    lv = jnp.clip(ml[:, DH:2 * DH], -10.0, 0.0)
    z = mu + eps * jnp.exp(0.5 * lv)

    # lane-dense 128-wide store: [ mu | logvar | z | 0-pad ]
    out_ref[...] = jnp.concatenate([mu, lv, z, jnp.zeros_like(z)], axis=-1)


def pack_params(params):
    """One-time packing: single (40, 512) weight slab, biases in row 32, q pre-scaled."""
    (wa, ba, we, be, wq, bq, wk, bk, wv, bv, wo, bo, wm, bm, wlv, blv) = params
    scale = 1.0 / math.sqrt(HEAD_DIM)

    w = jnp.zeros((W_ROWS, W_COLS), jnp.float32)
    # encoder (agent/other biases folded via indicator rows 28/29)
    w = w.at[0:DO + DC, W_ENC0:W_ENC0 + DH].set(wa)
    w = w.at[DO + DC:ENC_IN, W_ENC0:W_ENC0 + DH].set(we)
    w = w.at[COL_AG, W_ENC0:W_ENC0 + DH].set(ba)
    w = w.at[COL_OT, W_ENC0:W_ENC0 + DH].set(be)
    # fused QKV (1/sqrt(head_dim) folded into the q weight & bias)
    w = w.at[0:DH, W_QKV0:W_QKV0 + 3 * DH].set(jnp.concatenate([wq * scale, wk, wv], 1))
    w = w.at[BIAS_ROW, W_QKV0:W_QKV0 + 3 * DH].set(jnp.concatenate([bq * scale, bk, bv]))
    # output projection
    w = w.at[0:DH, W_O0:W_O0 + DH].set(wo)
    w = w.at[BIAS_ROW, W_O0:W_O0 + DH].set(bo)
    # mean | logvar
    w = w.at[0:DH, W_ML0:W_ML0 + 2 * DH].set(jnp.concatenate([wm, wlv], 1))
    w = w.at[BIAS_ROW, W_ML0:W_ML0 + 2 * DH].set(jnp.concatenate([bm, blv]))
    return w


def coach_forward(o, e, c, ms, eps, w_slab):
    f32 = jnp.float32

    # padded, bias-augmented encoder input (concat-built, no scatters)
    xin_a = jnp.concatenate(
        [o, c,
         jnp.zeros((BS, N_AGENTS, DE), f32),
         jnp.ones((BS, N_AGENTS, 1), f32),          # agent-bias indicator
         jnp.zeros((BS, N_AGENTS, 1), f32),
         jnp.zeros((BS, N_AGENTS, ENC_PAD - ENC_IN - 2), f32)], axis=-1)
    xin_o = jnp.concatenate(
        [jnp.zeros((BS, N_OTHERS, DO + DC), f32), e,
         jnp.zeros((BS, N_OTHERS, 1), f32),
         jnp.ones((BS, N_OTHERS, 1), f32),          # other-bias indicator
         jnp.zeros((BS, N_OTHERS, ENC_PAD - ENC_IN - 2), f32)], axis=-1)
    xin = jnp.concatenate([xin_a, xin_o], axis=1).reshape(BT, ENC_PAD)

    # additive (0 / -1e9) batch-local key mask, tiled across the 4 head blocks
    key_ok = ms.reshape(BT) > 0.0
    valid = jnp.logical_and(jnp.asarray(SAME_BATCH), key_ok[None, :])
    amask = jnp.where(valid, 0.0, -1e9).astype(f32)                   # (16, 16)
    amask = jnp.tile(amask, (1, N_HEADS))                             # (16, 64)

    act = jnp.concatenate([xin, eps.reshape(BT, DH), amask], axis=-1)  # (16, 128)

    vmem = pl.BlockSpec(memory_space=pltpu.MemorySpace.VMEM)
    out = pl.pallas_call(
        coach_kernel,
        out_shape=jax.ShapeDtypeStruct((BT, 4 * DH), jnp.float32),
        in_specs=[vmem, vmem],
        out_specs=vmem,
    )(act, w_slab)

    out = out.reshape(BS, N_TOKENS, 4 * DH)
    mu = out[..., 0:DH]
    lv = out[..., DH:2 * DH]
    z = out[..., 2 * DH:3 * DH]
    return z, mu, lv


# ---- pure-JAX reference (for correctness check) ----
def coach_ref(o, e, c, ms, eps, params):
    (wa, ba, we, be, wq, bq, wk, bk, wv, bv, wo, bo, wm, bm, wlv, blv) = params
    oc = jnp.concatenate([o, c], -1)
    ha = oc @ wa + ba
    he = e @ we + be
    x = jnp.concatenate([ha, he], 1)
    q = (x @ wq + bq).reshape(BS, N_TOKENS, N_HEADS, HEAD_DIM)
    k = (x @ wk + bk).reshape(BS, N_TOKENS, N_HEADS, HEAD_DIM)
    v = (x @ wv + bv).reshape(BS, N_TOKENS, N_HEADS, HEAD_DIM)
    sc = jnp.einsum('bnhd,bmhd->bhnm', q, k) / math.sqrt(HEAD_DIM)
    sc = jnp.where(ms[:, None, None, :] > 0, sc, -1e9)
    p = jax.nn.softmax(sc, -1)
    att = jnp.einsum('bhnm,bmhd->bnhd', p, v).reshape(BS, N_TOKENS, DH)
    h = att @ wo + bo
    mu = h @ wm + bm
    lv = jnp.clip(h @ wlv + blv, -10.0, 0.0)
    std = jnp.exp(0.5 * lv)
    return mu + eps * std, mu, lv


def init_params(key):
    def lin(k, din, dout):
        k1, k2 = jax.random.split(k)
        w = jax.random.normal(k1, (din, dout), jnp.float32) * 0.1
        b = jax.random.normal(k2, (dout,), jnp.float32) * 0.1
        return w, b

    keys = jax.random.split(key, 8)
    wa, ba = lin(keys[0], DO + DC, DH)
    we, be = lin(keys[1], DE, DH)
    wq, bq = lin(keys[2], DH, DH)
    wk, bk = lin(keys[3], DH, DH)
    wv, bv = lin(keys[4], DH, DH)
    wo, bo = lin(keys[5], DH, DH)
    wm, bm = lin(keys[6], DH, DH)
    wlv, blv = lin(keys[7], DH, DH)
    return (wa, ba, we, be, wq, bq, wk, bk, wv, bv, wo, bo, wm, bm, wlv, blv)


if __name__ == "__main__":
    key = jax.random.PRNGKey(0)
    kp, ko, ke, kc, km, keps = jax.random.split(key, 6)
    params = init_params(kp)
    w_slab = pack_params(params)             # one-time packing

    o = jax.random.normal(ko, (BS, N_AGENTS, DO), jnp.float32)
    e = jax.random.normal(ke, (BS, N_OTHERS, DE), jnp.float32)
    c = jax.random.normal(kc, (BS, N_AGENTS, DC), jnp.float32)
    ms = (jax.random.uniform(km, (BS, N_TOKENS)) > 0.2).astype(jnp.float32)
    ms = ms.at[:, 0].set(1.0)                # at least one valid key per row
    # TODO(synk): torch.randn_like inside strategy() replaced by externally drawn eps.
    eps = jax.random.normal(keps, (BS, N_TOKENS, DH), jnp.float32)

    fwd = jax.jit(coach_forward)
    z, mu, lv = fwd(o, e, c, ms, eps, w_slab)
    jax.block_until_ready((z, mu, lv))

    z_r, mu_r, lv_r = coach_ref(o, e, c, ms, eps, params)
    assert jnp.allclose(mu, mu_r, atol=1e-4), float(jnp.max(jnp.abs(mu - mu_r)))
    assert jnp.allclose(lv, lv_r, atol=1e-4), float(jnp.max(jnp.abs(lv - lv_r)))
    assert jnp.allclose(z, z_r, atol=1e-4), float(jnp.max(jnp.abs(z - z_r)))
    print("KERNEL_OK")
</pallas_src>

<mosaic_0001>
module attributes {stable_mosaic.version = 11 : i64} {
  func.func @coach_kernel(%arg0: memref<16x128xf32, #tpu.memory_space<vmem>>, %arg1: memref<40x512xf32, #tpu.memory_space<vmem>>, %arg2: memref<16x128xf32, #tpu.memory_space<vmem>>) attributes {dimension_semantics = [], scalar_prefetch = 0 : i64, scratch_operands = 0 : i64, tpu.core_type = #tpu.core_type<tc>} {
    %c0 = arith.constant 0 : index
    %c0_0 = arith.constant 0 : index
    %0 = vector.load %arg0[%c0, %c0_0] : memref<16x128xf32, #tpu.memory_space<vmem>>, vector<16x32xf32>
    %c0_1 = arith.constant 0 : index
    %c32 = arith.constant 32 : index
    %1 = vector.load %arg0[%c0_1, %c32] : memref<16x128xf32, #tpu.memory_space<vmem>>, vector<16x32xf32>
    %c0_2 = arith.constant 0 : index
    %c64 = arith.constant 64 : index
    %2 = vector.load %arg0[%c0_2, %c64] : memref<16x128xf32, #tpu.memory_space<vmem>>, vector<16x64xf32>
    %c0_3 = arith.constant 0 : index
    %c0_4 = arith.constant 0 : index
    %3 = vector.load %arg1[%c0_3, %c0_4] : memref<40x512xf32, #tpu.memory_space<vmem>>, vector<32x32xf32>
    %cst = arith.constant dense<0.000000e+00> : vector<16x32xf32>
    %4 = tpu.matmul %0, %3, %cst {dimension_numbers = #tpu.dot_dimension_numbers<[1], [0], [0], [1], [0, 0, 1, 1], [], []>} : vector<16x32xf32>, vector<32x32xf32>, vector<16x32xf32> -> vector<16x32xf32>
    %c0_5 = arith.constant 0 : index
    %c128 = arith.constant 128 : index
    %5 = vector.load %arg1[%c0_5, %c128] : memref<40x512xf32, #tpu.memory_space<vmem>>, vector<32x96xf32>
    %cst_6 = arith.constant dense<0.000000e+00> : vector<16x96xf32>
    %6 = tpu.matmul %4, %5, %cst_6 {dimension_numbers = #tpu.dot_dimension_numbers<[1], [0], [0], [1], [0, 0, 1, 1], [], []>} : vector<16x32xf32>, vector<32x96xf32>, vector<16x96xf32> -> vector<16x96xf32>
    %c32_7 = arith.constant 32 : index
    %c128_8 = arith.constant 128 : index
    %7 = vector.load %arg1[%c32_7, %c128_8] : memref<40x512xf32, #tpu.memory_space<vmem>>, vector<1x96xf32>
    %8 = vector.broadcast %7 : vector<1x96xf32> to vector<16x96xf32>
    %9 = arith.addf %6, %8 : vector<16x96xf32>
    %10 = vector.extract_strided_slice %9 {offsets = [0, 0], sizes = [16, 32], strides = [1, 1]} : vector<16x96xf32> to vector<16x32xf32>
    %11 = vector.extract_strided_slice %9 {offsets = [0, 32], sizes = [16, 32], strides = [1, 1]} : vector<16x96xf32> to vector<16x32xf32>
    %12 = vector.extract_strided_slice %9 {offsets = [0, 64], sizes = [16, 32], strides = [1, 1]} : vector<16x96xf32> to vector<16x32xf32>
    %13 = tpu.iota {dimensions = array<i32: 0>} : vector<64x32xi32>
    %14 = tpu.iota {dimensions = array<i32: 1>} : vector<64x32xi32>
    %c4_i32 = arith.constant 4 : i32
    %15 = vector.broadcast %c4_i32 : i32 to vector<64x32xi32>
    %16 = arith.shrsi %13, %15 : vector<64x32xi32>
    %c3_i32 = arith.constant 3 : i32
    %17 = vector.broadcast %c3_i32 : i32 to vector<64x32xi32>
    %18 = arith.shrsi %14, %17 : vector<64x32xi32>
    %19 = arith.cmpi eq, %16, %18 : vector<64x32xi32>
    %20 = arith.extui %19 : vector<64x32xi1> to vector<64x32xi32>
    %21 = arith.sitofp %20 : vector<64x32xi32> to vector<64x32xf32>
    %22 = tpu.concatenate %11, %11, %11, %11 in 0 : vector<16x32xf32>, vector<16x32xf32>, vector<16x32xf32>, vector<16x32xf32> -> vector<64x32xf32>
    %23 = arith.mulf %22, %21 : vector<64x32xf32>
    %24 = tpu.concatenate %12, %12, %12, %12 in 0 : vector<16x32xf32>, vector<16x32xf32>, vector<16x32xf32>, vector<16x32xf32> -> vector<64x32xf32>
    %25 = arith.mulf %24, %21 : vector<64x32xf32>
    %cst_9 = arith.constant dense<0.000000e+00> : vector<16x64xf32>
    %26 = tpu.matmul %10, %23, %cst_9 {dimension_numbers = #tpu.dot_dimension_numbers<[1], [1], [0], [0], [0, 0, 1, 0], [], []>} : vector<16x32xf32>, vector<64x32xf32>, vector<16x64xf32> -> vector<16x64xf32>
    %27 = arith.addf %26, %2 : vector<16x64xf32>
    %cst_10 = arith.constant dense<0xFF800000> : vector<16xf32>
    %28 = vector.multi_reduction <maximumf>, %27, %cst_10 [1] : vector<16x64xf32> to vector<16xf32>
    %29 = vector.shape_cast %28 : vector<16xf32> to vector<16x1xf32>
    %30 = vector.broadcast %29 : vector<16x1xf32> to vector<16x64xf32>
    %31 = arith.subf %27, %30 : vector<16x64xf32>
    %32 = math.exp %31 : vector<16x64xf32>
    %cst_11 = arith.constant dense<0.000000e+00> : vector<16x32xf32>
    %33 = tpu.matmul %32, %25, %cst_11 {dimension_numbers = #tpu.dot_dimension_numbers<[1], [0], [0], [1], [0, 0, 1, 1], [], []>} : vector<16x64xf32>, vector<64x32xf32>, vector<16x32xf32> -> vector<16x32xf32>
    %cst_12 = arith.constant dense<0.000000e+00> : vector<16x32xf32>
    %34 = tpu.matmul %32, %21, %cst_12 {dimension_numbers = #tpu.dot_dimension_numbers<[1], [0], [0], [1], [0, 0, 1, 1], [], []>} : vector<16x64xf32>, vector<64x32xf32>, vector<16x32xf32> -> vector<16x32xf32>
    %35 = tpu.reciprocal %34 : vector<16x32xf32> -> vector<16x32xf32>
    %36 = arith.mulf %33, %35 : vector<16x32xf32>
    %c0_13 = arith.constant 0 : index
    %c256 = arith.constant 256 : index
    %37 = vector.load %arg1[%c0_13, %c256] : memref<40x512xf32, #tpu.memory_space<vmem>>, vector<32x32xf32>
    %cst_14 = arith.constant dense<0.000000e+00> : vector<16x32xf32>
    %38 = tpu.matmul %36, %37, %cst_14 {dimension_numbers = #tpu.dot_dimension_numbers<[1], [0], [0], [1], [0, 0, 1, 1], [], []>} : vector<16x32xf32>, vector<32x32xf32>, vector<16x32xf32> -> vector<16x32xf32>
    %c32_15 = arith.constant 32 : index
    %c256_16 = arith.constant 256 : index
    %39 = vector.load %arg1[%c32_15, %c256_16] : memref<40x512xf32, #tpu.memory_space<vmem>>, vector<1x32xf32>
    %40 = vector.broadcast %39 : vector<1x32xf32> to vector<16x32xf32>
    %41 = arith.addf %38, %40 : vector<16x32xf32>
    %c0_17 = arith.constant 0 : index
    %c384 = arith.constant 384 : index
    %42 = vector.load %arg1[%c0_17, %c384] : memref<40x512xf32, #tpu.memory_space<vmem>>, vector<32x64xf32>
    %cst_18 = arith.constant dense<0.000000e+00> : vector<16x64xf32>
    %43 = tpu.matmul %41, %42, %cst_18 {dimension_numbers = #tpu.dot_dimension_numbers<[1], [0], [0], [1], [0, 0, 1, 1], [], []>} : vector<16x32xf32>, vector<32x64xf32>, vector<16x64xf32> -> vector<16x64xf32>
    %c32_19 = arith.constant 32 : index
    %c384_20 = arith.constant 384 : index
    %44 = vector.load %arg1[%c32_19, %c384_20] : memref<40x512xf32, #tpu.memory_space<vmem>>, vector<1x64xf32>
    %45 = vector.broadcast %44 : vector<1x64xf32> to vector<16x64xf32>
    %46 = arith.addf %43, %45 : vector<16x64xf32>
    %47 = vector.extract_strided_slice %46 {offsets = [0, 0], sizes = [16, 32], strides = [1, 1]} : vector<16x64xf32> to vector<16x32xf32>
    %48 = vector.extract_strided_slice %46 {offsets = [0, 32], sizes = [16, 32], strides = [1, 1]} : vector<16x64xf32> to vector<16x32xf32>
    %cst_21 = arith.constant -1.000000e+01 : f32
    %cst_22 = arith.constant 0.000000e+00 : f32
    %49 = vector.broadcast %cst_21 : f32 to vector<16x32xf32>
    %50 = arith.maximumf %49, %48 : vector<16x32xf32>
    %51 = vector.broadcast %cst_22 : f32 to vector<16x32xf32>
    %52 = arith.minimumf %51, %50 : vector<16x32xf32>
    %cst_23 = arith.constant 5.000000e-01 : f32
    %53 = vector.broadcast %cst_23 : f32 to vector<16x32xf32>
    %54 = arith.mulf %53, %52 : vector<16x32xf32>
    %55 = math.exp %54 : vector<16x32xf32>
    %56 = arith.mulf %1, %55 : vector<16x32xf32>
    %57 = arith.addf %47, %56 : vector<16x32xf32>
    %cst_24 = arith.constant 0.000000e+00 : f32
    %58 = vector.broadcast %cst_24 : f32 to vector<16x32xf32>
    %59 = tpu.concatenate %47, %52, %57, %58 in 1 : vector<16x32xf32>, vector<16x32xf32>, vector<16x32xf32>, vector<16x32xf32> -> vector<16x128xf32>
    %c0_25 = arith.constant 0 : index
    %c0_26 = arith.constant 0 : index
    %60 = vector.load %arg2[%c0_25, %c0_26] : memref<16x128xf32, #tpu.memory_space<vmem>>, vector<16x128xf32>
    tpu.vector_store %arg2[%c0_25, %c0_26], %59 {strides = array<i32>} : memref<16x128xf32, #tpu.memory_space<vmem>>, vector<16x128xf32>,
    return
  }
}

</mosaic_0001>

<bundles_post_ra>
// kernel: tile.9
= control target key start
LH: loop header
LB: loop body
LE: loop exit
PB: predicated region body
PF: predicated region fallthrough
CT: control target
= control target key end

     0   :  { %vm83_vm0 = vcmask 1047556   ;;  %vm85_vm1 = vcmask 130048   ;;  %s196_s9 = smov 48   ;;  %s197_s14 = smov 16   ;;  %vm104_vm2 = vcmask 523648   ;;  %vm125_vm3 = vcmask 392448   ;;  %s290_s0 = inlined_call_operand.vmem [shape: f32[16,4,16], index: 0, kind: input, shape index: {}]   ;;  %s291_s1 = inlined_call_operand.vmem [shape: f32[16,64], index: 1, kind: output, shape index: {}]  }
   0x1   :  { %v181_v0 = vld [vmem:[%s290_s0 + $0x1c] sm:$0xf]  ;;  %v182_v1 = vld [vmem:[%s290_s0 + $0x18] sm:$0xf]  ;;  %v183_v2 = vld [vmem:[%s290_s0 + $0x14] sm:$0xf] }
   0x2   :  { %49 = vst [vmem:[#allocation0 + $0x38] sm:$0xf] %v181_v0  ;;  %54 = vst [vmem:[#allocation0 + $0x30] sm:$0xf] %v182_v1  ;;  %v184_v3 = vld [vmem:[%s290_s0 + $0x10] sm:$0xf] }
   0x3   :  { %59 = vst [vmem:[#allocation0 + $0x28] sm:$0xf] %v183_v2  ;;  %v185_v4 = vld [vmem:[%s290_s0 + $0xc] sm:$0xf]  ;;  %v186_v5 = vld [vmem:[%s290_s0 + $0x8] sm:$0xf] }
   0x4   :  { %64 = vst [vmem:[#allocation0 + $0x20] sm:$0xf] %v184_v3  ;;  %69 = vst [vmem:[#allocation0 + $0x18] sm:$0xf] %v185_v4  ;;  %v187_v6 = vld [vmem:[%s290_s0 + $0x4] sm:$0xf] }
   0x5   :  { %74 = vst [vmem:[#allocation0 + $0x10] sm:$0xf] %v186_v5  ;;  %v79_v7 = vld [vmem:[%s290_s0] sm:$0xf]  ;;  %78 = vst [vmem:[#allocation0 + $0x8] sm:$0xf] %v187_v6 }
   0x6   :  { %80 = vst [vmem:[#allocation0] sm:$0xf] %v79_v7  ;;  %v173_v8 = vld [vmem:[%s290_s0 + $0x3c] sm:$0xf]  ;;  %v174_v9 = vld [vmem:[%s290_s0 + $0x38] sm:$0xf] }
   0x7   :  { %9 = vst [vmem:[#allocation0 + $0x78] sm:$0xf] %v173_v8  ;;  %14 = vst [vmem:[#allocation0 + $0x70] sm:$0xf] %v174_v9  ;;  %v175_v10 = vld [vmem:[%s290_s0 + $0x34] sm:$0xf] }
   0x8   :  { %v176_v11 = vld [vmem:[%s290_s0 + $0x30] sm:$0xf]  ;;  %v177_v12 = vld [vmem:[%s290_s0 + $0x2c] sm:$0xf]  ;;  %19 = vst [vmem:[#allocation0 + $0x68] sm:$0xf] %v175_v10 }
   0x9   :  { %24 = vst [vmem:[#allocation0 + $0x60] sm:$0xf] %v176_v11  ;;  %29 = vst [vmem:[#allocation0 + $0x58] sm:$0xf] %v177_v12  ;;  %v178_v13 = vld [vmem:[%s290_s0 + $0x28] sm:$0xf] }
   0xa   :  { %v179_v14 = vld [vmem:[%s290_s0 + $0x24] sm:$0xf]  ;;  %v180_v15 = vld [vmem:[%s290_s0 + $0x20] sm:$0xf]  ;;  %34 = vst [vmem:[#allocation0 + $0x50] sm:$0xf] %v178_v13 }
   0xb   :  { %39 = vst [vmem:[#allocation0 + $0x48] sm:$0xf] %v179_v14  ;;  %44 = vst [vmem:[#allocation0 + $0x40] sm:$0xf] %v180_v15  ;;  %s195_s0 = smov 32   ;;  %vm146_vm4 = vcmask 261248  }
   0xc   :  { %v120_v16 = vld [vmem:[#allocation0 + $0x2] ss:$8 sm:$0xf0]   ;;  %v99_v17 = vld [vmem:[#allocation0 + $0x3] ss:$8 sm:$0xf0]  }
   0xd   :  { %v118_v18 = vld [vmem:[#allocation0 + $0x2] ss:$8 sm:$0xf]   ;;  %v97_v19 = vld [vmem:[#allocation0 + $0x3] ss:$8 sm:$0xf]  }
   0xe   :  { %v122_v20 = vsel %vm83_vm0, %v120_v16, %v118_v18  ;;  %v101_v21 = vsel %vm83_vm0, %v99_v17, %v97_v19  ;;  %v139_v24 = vld [vmem:[#allocation0 + $0x1] ss:$8 sm:$0xf]   ;;  %v81_v32 = vld [vmem:[#allocation0] ss:$8 sm:$0xf]  }
   0xf   :  { %123 = vrot.lane.b32.xlu1 %v122_v20, %s195_s0  ;;  %102 = vrot.lane.b32.xlu0 %v101_v21, %s196_s9  ;;  %v141_v25 = vld [vmem:[#allocation0 + $0x1] ss:$8 sm:$0xf0]   ;;  %v82_v33 = vld [vmem:[#allocation0] ss:$8 sm:$0xf0]  }
  0x10   :  { %v130_v22 = vld [vmem:[#allocation0 + $0x42] ss:$8 sm:$0xf0]   ;;  %v109_v23 = vld [vmem:[#allocation0 + $0x43] ss:$8 sm:$0xf0]   ;;  %v84_v34 = vsel %vm83_vm0, %v82_v33, %v81_v32  ;;  %v143_v38 = vsel %vm83_vm0, %v141_v25, %v139_v24 }
  0x11   :  { %v151_v31 = vld [vmem:[#allocation0 + $0x41] ss:$8 sm:$0xf0]   ;;  %v90_v36 = vld [vmem:[#allocation0 + $0x40] ss:$8 sm:$0xf0]  }
  0x12   :  { %v128_v26 = vld [vmem:[#allocation0 + $0x42] ss:$8 sm:$0xf]   ;;  %v107_v27 = vld [vmem:[#allocation0 + $0x43] ss:$8 sm:$0xf]  }
  0x13   :  { %v132_v28 = vsel %vm83_vm0, %v130_v22, %v128_v26  ;;  %v111_v29 = vsel %vm83_vm0, %v109_v23, %v107_v27  ;;  %v149_v30 = vld [vmem:[#allocation0 + $0x41] ss:$8 sm:$0xf]   ;;  %v88_v35 = vld [vmem:[#allocation0 + $0x40] ss:$8 sm:$0xf]  }
  0x14   :  { %133 = vrot.lane.b32.xlu1 %v132_v28, %s195_s0  ;;  %112 = vrot.lane.b32.xlu0 %v111_v29, %s196_s9  ;;  %v153_v37 = vsel %vm83_vm0, %v151_v31, %v149_v30  ;;  %86 = vst.msk [vmem:[%s291_s1] sm:$0xff] %vm85_vm1, %v84_v34   ;;  %v92_v39 = vsel %vm83_vm0, %v90_v36, %v88_v35 }
  0x15   :  { %188 = vst.msk [vmem:[%s291_s1 + $0x8] sm:$0xff] %vm85_vm1, %v92_v39  }
  0x18   :  { %154 = vrot.lane.b32.xlu1 %v153_v37, %s197_s14  ;;  %144 = vrot.lane.b32.xlu0 %v143_v38, %s197_s14 }
  0x81   :  { %v124_v40 = vpop.permute.xlu1 %123   ;;  %v103_v41 = vpop.permute.xlu0 %102  }
  0x82   :  { %105 = vst.msk [vmem:[%s291_s1] sm:$0xff] %vm104_vm2, %v103_v41  }
  0x83   :  { %126 = vst.msk [vmem:[%s291_s1] sm:$0xff] %vm125_vm3, %v124_v40  }
  0x86   :  { %v134_v42 = vpop.permute.xlu1 %133   ;;  %v113_v43 = vpop.permute.xlu0 %112  }
  0x87   :  { %189 = vst.msk [vmem:[%s291_s1 + $0x8] sm:$0xff] %vm104_vm2, %v113_v43  }
  0x88   :  { %190 = vst.msk [vmem:[%s291_s1 + $0x8] sm:$0xff] %vm125_vm3, %v134_v42  }
  0x8a   :  { %v155_v44 = vpop.permute.xlu1 %154   ;;  %v145_v45 = vpop.permute.xlu0 %144  }
  0x8b   :  { %191 = vst.msk [vmem:[%s291_s1 + $0x8] sm:$0xff] %vm146_vm4, %v155_v44   ;;  %147 = vst.msk [vmem:[%s291_s1] sm:$0xff] %vm146_vm4, %v145_v45  }

// kernel: coach_forward.1
= control target key start
LH: loop header
LB: loop body
LE: loop exit
PB: predicated region body
PF: predicated region fallthrough
CT: control target
= control target key end

     0   :  { %vm17_vm0 = vcmask 261120   ;;  %v185_v10 = vlaneseq  ;;  %v1058_v30 = vmov 0.0   ;;  %s1060_s3 = smov 96   ;;  %s1061_s4 = smov 64   ;;  %vm428_vm9 = vcmask 523264   ;;  %s1325_s1 = inlined_call_operand.vmem [shape: f32[40,512], index: 1, kind: input, shape index: {}]   ;;  %s1326_s0 = inlined_call_operand.vmem [shape: f32[16,128], index: 0, kind: input, shape index: {}]   ;;  %s1327_s2 = inlined_call_operand.vmem [shape: f32[16,128], index: 2, kind: output, shape index: {}]  }
   0x1   :  { %v16_v0 = vld [vmem:[%s1325_s1 + $0x60] sm:$0xff]  ;;  %v102_v4 = vld [vmem:[%s1325_s1 + $0x68] sm:$0xff]  ;;  %v636_v26 = vld [vmem:[%s1325_s1 + $0x70] sm:$0xff]  ;;  %vm839_vm10 = vcmask 785408  }
   0x2   :  { %v15_v1 = vld [vmem:[%s1325_s1 + $0x40] sm:$0xff]  ;;  %940 = vmatprep.subr.mxu0 %v16_v0  ;;  %v101_v5 = vld [vmem:[%s1325_s1 + $0x48] sm:$0xff]  ;;  %951 = vmatprep.subr.mxu1 %v102_v4  ;;  %v186_v11 = vshrl.u32 %v185_v10, 7  ;;  %v195_v12 = vand.u32 127, %v185_v10  ;;  %v635_v27 = vld [vmem:[%s1325_s1 + $0x50] sm:$0xff] }
   0x3   :  { %v1087_v2 = vld [vmem:[%s1326_s0] sm:$0xff]  ;;  %941 = vmatpush3.msra.mxu0 %v16_v0  ;;  %952 = vmatpush3.msra.mxu1 %v102_v4  ;;  %v1106_v7 = vld [vmem:[%s1326_s0 + $0x8] sm:$0xff]  ;;  %s1059_s0 = smov 32   ;;  %v634_v28 = vld [vmem:[%s1325_s1 + $0x30] sm:$0xff] }
   0x4   :  { %v14_v3 = vld [vmem:[%s1325_s1 + $0x20] sm:$0xff]  ;;  %948 = vmatprep.mubr.msk.f32.mxu0 %vm17_vm0, %v1087_v2  ;;  %942 = vmatprep.subr.mxu0 %v15_v1  ;;  %v100_v8 = vld [vmem:[%s1325_s1 + $0x28] sm:$0xff]  ;;  %v193_v13 = vadd.s32 56, %v186_v11  ;;  %v204_v14 = vshra.s32 %v195_v12, 3  ;;  %v191_v15 = vadd.s32 40, %v186_v11  ;;  %v192_v16 = vadd.s32 48, %v186_v11 }
   0x5   :  { %943 = vmatpush3.msra.mxu0 %v15_v1  ;;  %v13_v6 = vld [vmem:[%s1325_s1] sm:$0xff]  ;;  %953 = vmatprep.subr.mxu1 %v101_v5  ;;  %v99_v9 = vld [vmem:[%s1325_s1 + $0x8] sm:$0xff]  ;;  %v190_v17 = vadd.s32 32, %v186_v11  ;;  %v189_v18 = vadd.s32 24, %v186_v11  ;;  %v188_v19 = vadd.s32 16, %v186_v11  ;;  %v187_v25 = vadd.s32 8, %v186_v11 }
   0x6   :  { %944 = vmatprep.subr.mxu0 %v14_v3  ;;  %954 = vmatpush3.msra.mxu1 %v101_v5  ;;  %v203_v20 = vshra.s32 %v193_v13, 4  ;;  %v201_v21 = vshra.s32 %v191_v15, 4  ;;  %v202_v22 = vshra.s32 %v192_v16, 4  ;;  %v196_v39 = vshra.s32 %v186_v11, 4  ;;  %v103_v50 = vld [vmem:[%s1325_s1 + $0x88] ss:$0 sm:$0xff] }
   0x7   :  { %945 = vmatpush3.msra.mxu0 %v14_v3  ;;  %955 = vmatprep.subr.mxu1 %v100_v8  ;;  %v200_v23 = vshra.s32 %v190_v17, 4  ;;  %v199_v24 = vshra.s32 %v189_v18, 4  ;;  %v198_v29 = vshra.s32 %v188_v19, 4  ;;  %v197_v38 = vshra.s32 %v187_v25, 4  ;;  %v633_v33 = vld [vmem:[%s1325_s1 + $0x10] sm:$0xff]  ;;  %v722_v36 = vld [vmem:[%s1325_s1 + $0x78] sm:$0xff] }
   0x8   :  { %946 = vmatprep.subr.mxu0 %v13_v6  ;;  %956 = vmatpush3.msra.mxu1 %v100_v8  ;;  %vm1116_vm1 = vcmp.eq.s32.totalorder %v203_v20, %v204_v14  ;;  %vm1120_vm2 = vcmp.eq.s32.totalorder %v201_v21, %v204_v14  ;;  %vm1124_vm3 = vcmp.eq.s32.totalorder %v202_v22, %v204_v14 }
   0x9   :  { %947 = vmatpush3.msra.mxu0 %v13_v6  ;;  %957 = vmatprep.subr.mxu1 %v99_v9  ;;  %v859_v31 = vsel %vm1116_vm1, 1.0, %v1058_v30  ;;  %v857_v32 = vsel %vm1120_vm2, 1.0, %v1058_v30  ;;  %vm1132_vm4 = vcmp.eq.s32.totalorder %v200_v23, %v204_v14  ;;  %v858_v34 = vsel %vm1124_vm3, 1.0, %v1058_v30 }
   0xa   :  { %949 = vmatmul.mubr.msk.f32.vlgmr.msra.gmra.mxu0 %vm17_vm0, %v1106_v7  ;;  %958 = vmatpush3.msra.mxu1 %v99_v9  ;;  %v856_v35 = vsel %vm1132_vm4, 1.0, %v1058_v30  ;;  %vm1140_vm5 = vcmp.eq.s32.totalorder %v199_v24, %v204_v14  ;;  %vm1144_vm6 = vcmp.eq.s32.totalorder %v198_v29, %v204_v14  ;;  %vm1152_vm7 = vcmp.eq.s32.totalorder %v197_v38, %v204_v14 }
   0xb   :  { %251 = vrot.lane.b32.xlu0 %v859_v31, %s1059_s0  ;;  %247 = vrot.lane.b32.xlu1 %v857_v32, %s1059_s0  ;;  %v855_v40 = vsel %vm1140_vm5, 1.0, %v1058_v30  ;;  %v854_v41 = vsel %vm1144_vm6, 1.0, %v1058_v30  ;;  %vm1156_vm8 = vcmp.eq.s32.totalorder %v196_v39, %v204_v14  ;;  %v853_v44 = vsel %vm1152_vm7, 1.0, %v1058_v30 }
   0xc   :  { %v852_v45 = vsel %vm1156_vm8, 1.0, %v1058_v30 }
   0xf   :  { %249 = vrot.lane.b32.xlu0 %v858_v34, %s1059_s0  ;;  %245 = vrot.lane.b32.xlu1 %v856_v35, %s1059_s0 }
  0x13   :  { %243 = vrot.lane.b32.xlu0 %v855_v40, %s1059_s0  ;;  %241 = vrot.lane.b32.xlu1 %v854_v41, %s1059_s0 }
  0x17   :  { %239 = vrot.lane.b32.xlu0 %v853_v44, %s1059_s0  ;;  %237 = vrot.lane.b32.xlu1 %v852_v45, %s1059_s0 }
  0x7d   :  { %v252_v48 = vpop.permute.xlu0 %251  ;;  %v248_v49 = vpop.permute.xlu1 %247 }
  0x81   :  { %v250_v51 = vpop.permute.xlu0 %249  ;;  %v246_v54 = vpop.permute.xlu1 %245 }
  0x85   :  { %v244_v59 = vpop.permute.xlu0 %243  ;;  %v242_v61 = vpop.permute.xlu1 %241 }
  0x89   :  { %v240_v0 = vpop.permute.xlu0 %239  ;;  %v238_v3 = vpop.permute.xlu1 %237 }
  0xca   :  { %v950_v46 = vpop.f32.mrf.mxu0 }
  0xcc   :  { %v90_v47 = vpop.f32.mrf.mxu0 }
  0xcd   :  { %959 = vmatprep.mubr.msk.f32.mxu1 %vm17_vm0, %v90_v47 }
  0xce   :  { %960 = vmatmul.mubr.msk.f32.vlgmr.msra.gmra.mxu1 %vm17_vm0, %v950_v46 }
 0x18e   :  { %v961_v52 = vpop.f32.mrf.mxu1 }
 0x18f   :  { %v1169_v53 = vadd.f32 %v961_v52, %v103_v50 }
 0x190   :  { %v176_v55 = vpop.f32.mrf.mxu1 }
 0x191   :  { %v1171_v56 = vadd.f32 %v176_v55, %v103_v50  ;;  %v268_v57 = vmul.f32 %v252_v48, %v1169_v53  ;;  %v266_v60 = vmul.f32 %v248_v49, %v1169_v53  ;;  %v264_v63 = vmul.f32 %v244_v59, %v1169_v53 }
 0x192   :  { %v262_v4 = vmul.f32 %v240_v0, %v1169_v53 }
 0x193   :  { %323 = vrot.lane.b32.xlu0 %v268_v57, %s1060_s3  ;;  %978 = vmatprep.mubr.msk.f32.mxu0 %vm17_vm0, %v1171_v56  ;;  %v267_v58 = vmul.f32 %v250_v51, %v1171_v56  ;;  %v265_v62 = vmul.f32 %v246_v54, %v1171_v56  ;;  %v263_v1 = vmul.f32 %v242_v61, %v1171_v56 }
 0x194   :  { %v261_v5 = vmul.f32 %v238_v3, %v1171_v56 }
 0x195   :  { %321 = vrot.lane.b32.xlu1 %v267_v58, %s1060_s3 }
 0x197   :  { %319 = vrot.lane.b32.xlu0 %v266_v60, %s1060_s3 }
 0x199   :  { %317 = vrot.lane.b32.xlu1 %v265_v62, %s1060_s3 }
 0x19b   :  { %315 = vrot.lane.b32.xlu0 %v264_v63, %s1060_s3 }
 0x19d   :  { %313 = vrot.lane.b32.xlu1 %v263_v1, %s1060_s3 }
 0x19f   :  { %311 = vrot.lane.b32.xlu0 %v262_v4, %s1060_s3 }
 0x1a1   :  { %309 = vrot.lane.b32.xlu1 %v261_v5, %s1060_s3 }
 0x1a3   :  { %325 = vrot.lane.b32.xlu0 %v1087_v2, %s1061_s4 }
 0x1a5   :  { %327 = vrot.lane.b32.xlu1 %v1106_v7, %s1061_s4 }
 0x1a7   :  { %283 = vrot.lane.b32.xlu0 %v859_v31, %s1061_s4 }
 0x1a9   :  { %281 = vrot.lane.b32.xlu1 %v858_v34, %s1061_s4 }
 0x1ab   :  { %279 = vrot.lane.b32.xlu0 %v857_v32, %s1061_s4 }
 0x1ad   :  { %277 = vrot.lane.b32.xlu1 %v856_v35, %s1061_s4 }
 0x1af   :  { %275 = vrot.lane.b32.xlu0 %v855_v40, %s1061_s4 }
 0x1b1   :  { %273 = vrot.lane.b32.xlu1 %v854_v41, %s1061_s4 }
 0x1b3   :  { %271 = vrot.lane.b32.xlu0 %v853_v44, %s1061_s4 }
 0x1b5   :  { %269 = vrot.lane.b32.xlu1 %v852_v45, %s1061_s4 }
 0x205   :  { %v324_v6 = vpop.permute.xlu0 %323 }
 0x206   :  { %962 = vmatprep.subr.msk.mxu0 %vm17_vm0, %v324_v6 }
 0x207   :  { %963 = vmatpush3.xpose.msk.msra.mxu0 %vm17_vm0, %v324_v6  ;;  %v322_v8 = vpop.permute.xlu1 %321  ;;  %v721_v6 = vld [vmem:[%s1325_s1 + $0x58] sm:$0xff] }
 0x208   :  { %964 = vmatprep.subr.msk.mxu0 %vm17_vm0, %v322_v8 }
 0x209   :  { %v320_v9 = vpop.permute.xlu0 %319 }
 0x20b   :  { %965 = vmatpush3.xpose.msk.msra.mxu0 %vm17_vm0, %v322_v8  ;;  %v318_v10 = vpop.permute.xlu1 %317  ;;  %v720_v8 = vld [vmem:[%s1325_s1 + $0x38] sm:$0xff] }
 0x20c   :  { %966 = vmatprep.subr.msk.mxu0 %vm17_vm0, %v320_v9 }
 0x20d   :  { %v316_v11 = vpop.permute.xlu0 %315 }
 0x20f   :  { %967 = vmatpush3.xpose.msk.msra.mxu0 %vm17_vm0, %v320_v9  ;;  %v314_v12 = vpop.permute.xlu1 %313  ;;  %v719_v9 = vld [vmem:[%s1325_s1 + $0x18] sm:$0xff] }
 0x210   :  { %968 = vmatprep.subr.msk.mxu0 %vm17_vm0, %v318_v10 }
 0x211   :  { %v312_v13 = vpop.permute.xlu0 %311 }
 0x213   :  { %969 = vmatpush3.xpose.msk.msra.mxu0 %vm17_vm0, %v318_v10  ;;  %v310_v14 = vpop.permute.xlu1 %309 }
 0x214   :  { %970 = vmatprep.subr.msk.mxu0 %vm17_vm0, %v316_v11 }
 0x215   :  { %v326_v15 = vpop.permute.xlu0 %325 }
 0x217   :  { %971 = vmatpush3.xpose.msk.msra.mxu0 %vm17_vm0, %v316_v11  ;;  %v328_v16 = vpop.permute.xlu1 %327  ;;  %v637_v11 = vld [vmem:[%s1325_s1 + $0x90] ss:$0 sm:$0xff] }
 0x218   :  { %972 = vmatprep.subr.msk.mxu0 %vm17_vm0, %v314_v12 }
 0x219   :  { %v284_v17 = vpop.permute.xlu0 %283 }
 0x21a   :  { %v300_v18 = vmul.f32 %v284_v17, %v1169_v53 }
 0x21b   :  { %973 = vmatpush3.xpose.msk.msra.mxu0 %vm17_vm0, %v314_v12  ;;  %v282_v19 = vpop.permute.xlu1 %281 }
 0x21c   :  { %v299_v20 = vmul.f32 %v282_v19, %v1171_v56  ;;  %463 = vrot.lane.b32.xlu0 %v300_v18, %s1061_s4  ;;  %974 = vmatprep.subr.msk.mxu0 %vm17_vm0, %v312_v13 }
 0x21d   :  { %v280_v21 = vpop.permute.xlu0 %279 }
 0x21e   :  { %v298_v22 = vmul.f32 %v280_v21, %v1169_v53  ;;  %461 = vrot.lane.b32.xlu1 %v299_v20, %s1061_s4 }
 0x21f   :  { %975 = vmatpush3.xpose.msk.msra.mxu0 %vm17_vm0, %v312_v13  ;;  %v278_v23 = vpop.permute.xlu1 %277 }
 0x220   :  { %v297_v24 = vmul.f32 %v278_v23, %v1171_v56  ;;  %459 = vrot.lane.b32.xlu0 %v298_v22, %s1061_s4  ;;  %976 = vmatprep.subr.msk.mxu0 %vm17_vm0, %v310_v14 }
 0x221   :  { %v276_v25 = vpop.permute.xlu0 %275 }
 0x222   :  { %v296_v29 = vmul.f32 %v276_v25, %v1169_v53  ;;  %457 = vrot.lane.b32.xlu1 %v297_v24, %s1061_s4 }
 0x223   :  { %977 = vmatpush3.xpose.msk.msra.mxu0 %vm17_vm0, %v310_v14  ;;  %v274_v30 = vpop.permute.xlu1 %273 }
 0x224   :  { %v295_v31 = vmul.f32 %v274_v30, %v1171_v56  ;;  %455 = vrot.lane.b32.xlu0 %v296_v29, %s1061_s4  ;;  %1019 = vmatprep.subr.mxu0 %v636_v26 }
 0x225   :  { %v272_v32 = vpop.permute.xlu0 %271 }
 0x226   :  { %979 = vmatmul.mubr.msk.f32.vlgmr.msra.gmra.mxu0 %vm17_vm0, %v1169_v53  ;;  %453 = vrot.lane.b32.xlu1 %v295_v31, %s1061_s4  ;;  %v294_v52 = vmul.f32 %v272_v32, %v1169_v53 }
 0x227   :  { %v270_v34 = vpop.permute.xlu1 %269  ;;  %1020 = vmatpush3.msra.mxu0 %v636_v26 }
 0x228   :  { %v293_v51 = vmul.f32 %v270_v34, %v1171_v56  ;;  %v1062_v56 = vmov 1.0   ;;  %1021 = vmatprep.subr.mxu0 %v635_v27 }
 0x229   :  { %1022 = vmatpush3.msra.mxu0 %v635_v27 }
 0x22a   :  { %1023 = vmatprep.subr.mxu0 %v634_v28 }
 0x22b   :  { %1024 = vmatpush3.msra.mxu0 %v634_v28 }
 0x22c   :  { %1025 = vmatprep.subr.mxu0 %v633_v33 }
 0x22d   :  { %1026 = vmatpush3.msra.mxu0 %v633_v33 }
 0x28e   :  { %v464_v35 = vpop.permute.xlu0 %463 }
 0x28f   :  { %981 = vmatprep.subr.mxu1 %v464_v35 }
 0x290   :  { %982 = vmatpush3.msra.mxu1 %v464_v35  ;;  %v462_v38 = vpop.permute.xlu1 %461 }
 0x291   :  { %983 = vmatprep.subr.mxu1 %v462_v38 }
 0x292   :  { %v460_v39 = vpop.permute.xlu0 %459  ;;  %984 = vmatpush3.msra.mxu1 %v462_v38 }
 0x293   :  { %985 = vmatprep.subr.mxu1 %v460_v39 }
 0x294   :  { %986 = vmatpush3.msra.mxu1 %v460_v39  ;;  %v458_v40 = vpop.permute.xlu1 %457 }
 0x295   :  { %987 = vmatprep.subr.mxu1 %v458_v40 }
 0x296   :  { %v456_v41 = vpop.permute.xlu0 %455  ;;  %988 = vmatpush3.msra.mxu1 %v458_v40 }
 0x297   :  { %989 = vmatprep.subr.mxu1 %v456_v41 }
 0x298   :  { %990 = vmatpush3.msra.mxu1 %v456_v41  ;;  %v454_v44 = vpop.permute.xlu1 %453 }
 0x299   :  { %991 = vmatprep.subr.mxu1 %v454_v44 }
 0x29a   :  { %992 = vmatpush3.msra.mxu1 %v454_v44 }
 0x2e6   :  { %v980_v45 = vpop.f32.mrf.mxu0 }
 0x2e7   :  { %v425_v46 = vadd.f32 %v980_v45, %v328_v16 }
 0x2e8   :  { %v419_v47 = vpop.f32.mrf.mxu0 }
 0x2e9   :  { %v420_v48 = vadd.f32 %v419_v47, %v326_v15  ;;  %v432_v49 = vsel %vm428_vm9, %v425_v46, -inf  ;;  %v723_v15 = vld [vmem:[%s1325_s1 + $0x98] ss:$0 sm:$0xff] }
 0x2ea   :  { %433 = vmax.xlane.f32.xlu1 %v432_v49 }
 0x2eb   :  { %v429_v50 = vsel %vm428_vm9, %v420_v48, -inf }
 0x2ec   :  { %430 = vmax.xlane.f32.xlu0 %v429_v50 }
 0x2fb   :  { %449 = vrot.lane.b32.xlu1 %v293_v51, %s1061_s4 }
 0x302   :  { %451 = vrot.lane.b32.xlu0 %v294_v52, %s1061_s4 }
 0x373   :  { %v434_v54 = vpop.xlane.xlu1 %433 }
 0x374   :  { %v436_v55 = vsub.f32 %v425_v46, %v434_v54 }
 0x375   :  { %v431_v57 = vpop.xlane.xlu0 %430 }
 0x376   :  { %v435_v58 = vsub.f32 %v420_v48, %v431_v57  ;;  %v439_v59 = vmul.f32 1.442695, %v436_v55 }
 0x377   :  { %v450_v62 = vpop.permute.xlu1 %449 }
 0x378   :  { %v437_v60 = vmul.f32 1.442695, %v435_v58 }
 0x379   :  { %v452_v61 = vpop.permute.xlu0 %451 }
 0x37a   :  { %1046 = vpow2.f32 %v437_v60  ;;  %993 = vmatprep.subr.mxu1 %v452_v61 }
 0x37b   :  { %1048 = vpow2.f32 %v439_v59  ;;  %994 = vmatpush3.msra.mxu1 %v452_v61 }
 0x37c   :  { %995 = vmatprep.subr.mxu1 %v450_v62 }
 0x37d   :  { %996 = vmatpush3.msra.mxu1 %v450_v62 }
 0x37e   :  { %1000 = vmatprep.subr.msk.mxu1 %vm1116_vm1, %v1062_v56 }
 0x387   :  { %v1047_v53 = vpop.eup %1046 }
 0x388   :  { %v1049_v63 = vpop.eup %1048  ;;  %997 = vmatprep.mubr.msk.f32.mxu1 %vm428_vm9, %v1047_v53 }
 0x389   :  { %998 = vmatmul.mubr.msk.f32.vlgmr.msra.gmra.mxu1 %vm428_vm9, %v1049_v63 }
 0x38a   :  { %1001 = vmatpush3.msk.msra.mxu1 %vm1116_vm1, %v1062_v56  ;;  %1016 = vmatprep.mubr.msk.f32.mxu1 %vm428_vm9, %v1047_v53 }
 0x38b   :  { %1002 = vmatprep.subr.msk.mxu1 %vm1124_vm3, %v1062_v56 }
 0x38c   :  { %1003 = vmatpush3.msk.msra.mxu1 %vm1124_vm3, %v1062_v56 }
 0x38d   :  { %1004 = vmatprep.subr.msk.mxu1 %vm1120_vm2, %v1062_v56 }
 0x38e   :  { %1005 = vmatpush3.msk.msra.mxu1 %vm1120_vm2, %v1062_v56 }
 0x38f   :  { %1006 = vmatprep.subr.msk.mxu1 %vm1132_vm4, %v1062_v56 }
 0x390   :  { %1007 = vmatpush3.msk.msra.mxu1 %vm1132_vm4, %v1062_v56 }
 0x391   :  { %1008 = vmatprep.subr.msk.mxu1 %vm1140_vm5, %v1062_v56 }
 0x392   :  { %1009 = vmatpush3.msk.msra.mxu1 %vm1140_vm5, %v1062_v56 }
 0x393   :  { %1010 = vmatprep.subr.msk.mxu1 %vm1144_vm6, %v1062_v56 }
 0x394   :  { %1011 = vmatpush3.msk.msra.mxu1 %vm1144_vm6, %v1062_v56 }
 0x395   :  { %1012 = vmatprep.subr.msk.mxu1 %vm1152_vm7, %v1062_v56 }
 0x396   :  { %1013 = vmatpush3.msk.msra.mxu1 %vm1152_vm7, %v1062_v56 }
 0x397   :  { %1014 = vmatprep.subr.msk.mxu1 %vm1156_vm8, %v1062_v56 }
 0x398   :  { %1015 = vmatpush3.msk.msra.mxu1 %vm1156_vm8, %v1062_v56 }
 0x399   :  { %1017 = vmatmul.mubr.msk.f32.vlgmr.msra.gmra.mxu1 %vm428_vm9, %v1049_v63  ;;  %1030 = vmatprep.subr.mxu1 %v722_v36 }
 0x39a   :  { %1031 = vmatpush3.msra.mxu1 %v722_v36 }
 0x39b   :  { %1032 = vmatprep.subr.mxu1 %v721_v6 }
 0x39c   :  { %1033 = vmatpush3.msra.mxu1 %v721_v6 }
 0x39d   :  { %1034 = vmatprep.subr.mxu1 %v720_v8 }
 0x39e   :  { %1035 = vmatpush3.msra.mxu1 %v720_v8 }
 0x39f   :  { %1036 = vmatprep.subr.mxu1 %v719_v9 }
 0x3a0   :  { %1037 = vmatpush3.msra.mxu1 %v719_v9 }
 0x449   :  { %v999_v37 = vpop.f32.mrf.mxu1 }
 0x44b   :  { %v545_v42 = vpop.f32.mrf.mxu1 }
 0x459   :  { %v1018_v43 = vpop.f32.mrf.mxu1 }
 0x45a   :  { %1050 = vrcp.f32 %v1018_v43 }
 0x45b   :  { %v620_v0 = vpop.f32.mrf.mxu1 }
 0x45c   :  { %1052 = vrcp.f32 %v620_v0 }
 0x467   :  { %v1051_v1 = vpop.eup %1050 }
 0x468   :  { %v632_v5 = vmul.f32 %v1051_v1, %v999_v37 }
 0x469   :  { %v1053_v3 = vpop.eup %1052 }
 0x46a   :  { %v631_v4 = vmul.f32 %v1053_v3, %v545_v42 }
 0x46c   :  { %1027 = vmatprep.mubr.msk.f32.mxu0 %vm17_vm0, %v631_v4 }
 0x46d   :  { %1028 = vmatmul.mubr.msk.f32.vlgmr.msra.gmra.mxu0 %vm17_vm0, %v632_v5 }
 0x52d   :  { %v1029_v10 = vpop.f32.mrf.mxu0 }
 0x52e   :  { %v716_v14 = vadd.f32 %v1029_v10, %v637_v11 }
 0x52f   :  { %v710_v12 = vpop.f32.mrf.mxu0 }
 0x530   :  { %v711_v13 = vadd.f32 %v710_v12, %v637_v11 }
 0x532   :  { %1038 = vmatprep.mubr.msk.f32.mxu1 %vm17_vm0, %v711_v13 }
 0x533   :  { %1039 = vmatmul.mubr.msk.f32.vlgmr.msra.gmra.mxu1 %vm17_vm0, %v716_v14 }
 0x5f3   :  { %v1040_v16 = vpop.f32.mrf.mxu1 }
 0x5f4   :  { %v802_v17 = vadd.f32 %v1040_v16, %v723_v15 }
 0x5f5   :  { %v796_v18 = vpop.f32.mrf.mxu1 }
 0x5f6   :  { %v806_v19 = vmax.f32 %v802_v17, -10.0  ;;  %v797_v20 = vadd.f32 %v796_v18, %v723_v15 }
 0x5f8   :  { %v808_v21 = vmin.f32 %v806_v19, 0.0  ;;  %v805_v22 = vmax.f32 %v797_v20, -10.0 }
 0x5fa   :  { %v810_v23 = vmul.f32 0.5, %v808_v21  ;;  %v807_v24 = vmin.f32 %v805_v22, 0.0  ;;  %v836_v44 = vsel %vm17_vm0, %v802_v17, %v808_v21 }
 0x5fc   :  { %v813_v25 = vmul.f32 1.442695, %v810_v23  ;;  %v809_v29 = vmul.f32 0.5, %v807_v24  ;;  %v835_v47 = vsel %vm17_vm0, %v797_v20, %v807_v24 }
 0x5fe   :  { %1054 = vpow2.f32 %v813_v25  ;;  %v811_v30 = vmul.f32 1.442695, %v809_v29 }
 0x600   :  { %1056 = vpow2.f32 %v811_v30 }
 0x60b   :  { %v1055_v31 = vpop.eup %1054 }
 0x60c   :  { %v816_v32 = vmul.f32 %v1055_v31, %v1106_v7 }
 0x60d   :  { %v1057_v34 = vpop.eup %1056 }
 0x60e   :  { %821 = vrot.lane.b32.xlu1 %v816_v32, %s1060_s3  ;;  %v815_v35 = vmul.f32 %v1057_v34, %v1087_v2 }
 0x610   :  { %819 = vrot.lane.b32.xlu0 %v815_v35, %s1060_s3 }
 0x680   :  { %v822_v38 = vpop.permute.xlu1 %821 }
 0x681   :  { %v826_v39 = vadd.f32 %v822_v38, %v802_v17 }
 0x682   :  { %v820_v40 = vpop.permute.xlu0 %819 }
 0x683   :  { %v825_v41 = vadd.f32 %v820_v40, %v797_v20  ;;  %831 = vrot.lane.b32.xlu1 %v826_v39, %s1061_s4 }
 0x685   :  { %829 = vrot.lane.b32.xlu0 %v825_v41, %s1061_s4 }
 0x6f5   :  { %v832_v45 = vpop.permute.xlu1 %831 }
 0x6f6   :  { %v838_v7 = vsel %vm428_vm9, %v836_v44, %v832_v45 }
 0x6f7   :  { %v841_v46 = vsel %vm839_vm10, %v838_v7, 0.0  ;;  %v830_v2 = vpop.permute.xlu0 %829 }
 0x6f8   :  { %843 = vst [vmem:[%s1327_s2 + $0x8] sm:$0xff] %v841_v46  ;;  %v837_v48 = vsel %vm428_vm9, %v835_v47, %v830_v2 }
 0x6f9   :  { %v840_v49 = vsel %vm839_vm10, %v837_v48, 0.0 }
 0x6fa   :  { %842 = vst [vmem:[%s1327_s2] sm:$0xff] %v840_v49 }

</bundles_post_ra>
